<compile_context>
chip_gen: v7x
topology: tpu7x:2x2x1
jax: 0.10.0
libtpu: 0.0.40
codegen_flags: <defaults>
</compile_context>

<pallas_src>
import functools

import jax
import jax.numpy as jnp
from jax.experimental import pallas as pl
from jax.experimental.pallas import tpu as pltpu


def _weighted_attention_kernel(
    x_ref,     # (Bt, Ni, D)  inputs (slots / queries)
    c_ref,     # (Bt, Nj, D)  context
    wq_ref,    # (D, D)   to_q weight^T, LayerNorm gamma and `scale` folded in
    bq_ref,    # (1, D)   to_q bias (beta @ Wq^T and `scale` folded in), f32
    wkv_ref,   # (D, 2D)  fused [to_k | to_v] weight^T, LayerNorm gamma folded in
    bkv_ref,   # (1, 2D)  fused biases, f32
    o_ref,     # (Bt, Ni, D)
    *,
    eps,
    ln_eps,
    mxu_dtype,
    approx_recip,
):
    f32 = jnp.float32
    bt, ni, d = x_ref.shape
    nj = c_ref.shape[1]

    x = x_ref[...].astype(f32)   # (Bt, Ni, D)
    c = c_ref[...].astype(f32)   # (Bt, Nj, D)

    def _layernorm(t):
        # Affine (gamma/beta) already folded into projection weights/biases.
        mu = jnp.mean(t, axis=-1, keepdims=True)
        var = jnp.mean(jnp.square(t - mu), axis=-1, keepdims=True)
        return (t - mu) * jax.lax.rsqrt(var + ln_eps)

    # Flatten the batch block into the MXU M dimension (free reshape: Ni, Nj
    # are multiples of 8, D is the unchanged lane dim).
    xh = _layernorm(x).reshape(bt * ni, d)
    ch = _layernorm(c).reshape(bt * nj, d)

    # Projections: one matmul for q, one fused matmul for k|v.  Only the MXU
    # operands are cast to `mxu_dtype`; accumulation and biases stay f32.
    q = jnp.dot(xh.astype(mxu_dtype), wq_ref[...],
                preferred_element_type=f32) + bq_ref[...]          # (Bt*Ni, D)
    kv = jnp.dot(ch.astype(mxu_dtype), wkv_ref[...],
                 preferred_element_type=f32) + bkv_ref[...]        # (Bt*Nj, 2D)
    k = kv[:, :d]
    v = kv[:, d:]

    qb = q.reshape(bt, ni, d)
    kb = k.reshape(bt, nj, d)
    vb = v.reshape(bt, nj, d)

    # dots[b, i, j] = <q[b, i], k[b, j]>   (`scale` already folded into Wq/bq)
    dots = jnp.einsum(
        "bid,bjd->bij", qb.astype(mxu_dtype), kb.astype(mxu_dtype),
        preferred_element_type=f32)                                # (Bt, Ni, Nj)

    # Softmax over the slot axis (torch dim=1 == axis 1 of (Bt, Ni, Nj)).
    m = jnp.max(dots, axis=1, keepdims=True)
    e = jnp.exp(dots - m)
    inv_sm = pl.reciprocal(jnp.sum(e, axis=1, keepdims=True), approx=approx_recip)
    p = e * inv_sm + eps                                           # (Bt, Ni, Nj)

    # Weighted mean over the context axis (torch dim=2), applied AFTER the
    # matmul: (p / denom) @ v == (p @ v) * (1 / denom).
    denom = jnp.sum(p, axis=2, keepdims=True)                      # (Bt, Ni, 1)
    upd = jnp.einsum(
        "bij,bjd->bid", p.astype(mxu_dtype), vb.astype(mxu_dtype),
        preferred_element_type=f32)                                # (Bt, Ni, D)
    upd = upd * pl.reciprocal(denom, approx=approx_recip)

    o_ref[...] = upd.astype(o_ref.dtype)


def _resident_spec(shape):
    """BlockSpec for a grid-invariant operand (weights/biases): constant
    index_map + single-buffered pipeline (no useless second buffer)."""
    index_map = lambda *_: (0,) * len(shape)
    buffered = getattr(pl, "Buffered", None)
    if buffered is not None:
        try:
            return pl.BlockSpec(shape, index_map, pipeline_mode=buffered(1))
        except TypeError:  # older BlockSpec without pipeline_mode kwarg
            pass
    return pl.BlockSpec(shape, index_map)


def _choose_batch_block(b, ni, nj, d, itemsize, budget_bytes=4 << 20):
    """Largest Bt dividing b such that the grid keeps >=2 parallel steps (both
    v7x TensorCores busy) and double-buffered I/O blocks fit a VMEM budget."""
    best = 1
    for bt in range(1, b + 1):
        if b % bt:
            continue
        if b >= 2 and (b // bt) < 2:
            continue
        io_bytes = 2 * bt * (2 * ni + nj) * d * itemsize   # in+out, double-buffered
        if io_bytes <= budget_bytes:
            best = bt
    return best


def weighted_attention(inputs, context, params, *, eps=1e-8, ln_eps=1e-5,
                       mxu_dtype=jnp.float32, approx_recip=False,
                       batch_block=None):
    """inputs: (b, Ni, d), context: (b, Nj, d) -> (b, Ni, d)."""
    b, ni, d = inputs.shape
    b2, nj, d2 = context.shape
    assert b == b2 and d == d2
    scale = float(d) ** -0.5
    f32 = jnp.float32

    g_in = params["ln_in_gamma"].astype(f32)
    be_in = params["ln_in_beta"].astype(f32)
    g_ctx = params["ln_ctx_gamma"].astype(f32)
    be_ctx = params["ln_ctx_beta"].astype(f32)

    def fold(w, bias, gamma, beta, s=1.0):
        # y = gamma*xhat + beta ; (y @ W^T + b)*s == xhat @ (s*gamma[:,None]*W^T)
        #                                            + s*(beta @ W^T + b)
        wt = w.astype(f32).T                   # (d, d), pre-transposed
        w_eff = wt * (gamma[:, None] * s)
        b_eff = (beta @ wt + bias.astype(f32)) * s
        return w_eff, b_eff.reshape(1, -1)

    wq, bq = fold(params["w_q"], params["b_q"], g_in, be_in, s=scale)  # scale folded
    wk, bk = fold(params["w_k"], params["b_k"], g_ctx, be_ctx)
    wv, bv = fold(params["w_v"], params["b_v"], g_ctx, be_ctx)

    # Fuse K and V projections into a single (d, 2d) matmul.
    wkv = jnp.concatenate([wk, wv], axis=1)        # (d, 2d)
    bkv = jnp.concatenate([bk, bv], axis=1)        # (1, 2d)

    # Only MXU operands take the reduced dtype; biases stay f32.
    wq = wq.astype(mxu_dtype)
    wkv = wkv.astype(mxu_dtype)

    in_itemsize = jnp.dtype(inputs.dtype).itemsize
    if batch_block is None:
        batch_block = _choose_batch_block(b, ni, nj, d, in_itemsize)
    bt = batch_block
    assert b % bt == 0, (b, bt)
    grid = (b // bt,)

    # Explicit VMEM budget: double-buffered I/O blocks + single-buffered
    # weights + in-kernel intermediates, with headroom; clamped to 32 MiB so it
    # is valid on every generation (v7x default scoped limit).
    mxu_itemsize = jnp.dtype(mxu_dtype).itemsize
    io_bytes = 2 * bt * (2 * ni + nj) * d * in_itemsize
    weight_bytes = 3 * d * d * mxu_itemsize + 3 * d * 4
    interm_bytes = bt * (ni * nj + (ni + 2 * nj) * d + 2 * ni * d) * 4
    vmem_limit = int(min(32 << 20,
                         max(2 << 20, 4 * (io_bytes + weight_bytes + interm_bytes))))

    kernel = functools.partial(
        _weighted_attention_kernel,
        eps=eps, ln_eps=ln_eps, mxu_dtype=mxu_dtype, approx_recip=approx_recip,
    )

    out = pl.pallas_call(
        kernel,
        out_shape=jax.ShapeDtypeStruct((b, ni, d), inputs.dtype),
        grid_spec=pltpu.PrefetchScalarGridSpec(
            num_scalar_prefetch=0,
            grid=grid,
            in_specs=[
                pl.BlockSpec((bt, ni, d), lambda i: (i, 0, 0)),   # inputs block
                pl.BlockSpec((bt, nj, d), lambda i: (i, 0, 0)),   # context block
                _resident_spec((d, d)),                           # Wq^T (folded)
                _resident_spec((1, d)),                           # bq  (folded)
                _resident_spec((d, 2 * d)),                       # [Wk|Wv]^T (folded)
                _resident_spec((1, 2 * d)),                       # [bk|bv]  (folded)
            ],
            out_specs=pl.BlockSpec((bt, ni, d), lambda i: (i, 0, 0)),
        ),
        compiler_params=pltpu.CompilerParams(
            dimension_semantics=("parallel",),   # batch blocks -> megacore / 2 TCs
            vmem_limit_bytes=vmem_limit,
        ),
    )(inputs, context, wq, bq, wkv, bkv)
    return out


def init_params(key, dim):
    """Deterministic params matching torch shapes (Linear: weight (d,d), bias (d,))."""
    k = 1.0 / jnp.sqrt(jnp.float32(dim))
    keys = jax.random.split(key, 10)
    u = lambda kk, shape: jax.random.uniform(
        kk, shape, dtype=jnp.float32, minval=-k, maxval=k
    )
    return {
        "w_q": u(keys[0], (dim, dim)),
        "b_q": u(keys[1], (dim,)),
        "w_k": u(keys[2], (dim, dim)),
        "b_k": u(keys[3], (dim,)),
        "w_v": u(keys[4], (dim, dim)),
        "b_v": u(keys[5], (dim,)),
        # Random (non-default) LayerNorm affine to exercise the folding path.
        "ln_in_gamma": 1.0 + 0.1 * u(keys[6], (dim,)),
        "ln_in_beta": 0.1 * u(keys[7], (dim,)),
        "ln_ctx_gamma": 1.0 + 0.1 * u(keys[8], (dim,)),
        "ln_ctx_beta": 0.1 * u(keys[9], (dim,)),
    }


def weighted_attention_ref(inputs, context, params, *, eps=1e-8, ln_eps=1e-5):
    """Pure-JAX reference mirroring the PyTorch forward exactly."""
    d = inputs.shape[-1]
    scale = float(d) ** -0.5

    def ln(t, gamma, beta):
        mu = jnp.mean(t, axis=-1, keepdims=True)
        var = jnp.mean(jnp.square(t - mu), axis=-1, keepdims=True)
        return (t - mu) / jnp.sqrt(var + ln_eps) * gamma + beta

    x = ln(inputs, params["ln_in_gamma"], params["ln_in_beta"])
    c = ln(context, params["ln_ctx_gamma"], params["ln_ctx_beta"])
    q = x @ params["w_q"].T + params["b_q"]
    k = c @ params["w_k"].T + params["b_k"]
    v = c @ params["w_v"].T + params["b_v"]
    dots = jnp.einsum("bid,bjd->bij", q, k) * scale
    attn = jax.nn.softmax(dots, axis=1) + eps
    attn = attn / jnp.sum(attn, axis=2, keepdims=True)
    return jnp.einsum("bjd,bij->bid", v, attn)


if __name__ == "__main__":
    key = jax.random.PRNGKey(0)
    k_in, k_ctx, k_par = jax.random.split(key, 3)

    # Small shapes consistent with the module; b=4 exercises batch blocking
    # (Bt=2 -> grid of 2 parallel steps).
    b, n_slots, n_ctx, d = 4, 8, 16, 32
    inputs = jax.random.normal(k_in, (b, n_slots, d), dtype=jnp.float32)
    context = jax.random.normal(k_ctx, (b, n_ctx, d), dtype=jnp.float32)
    params = init_params(k_par, d)

    ref = weighted_attention_ref(inputs, context, params)

    # Exact-parity f32 path.
    out = jax.block_until_ready(weighted_attention(inputs, context, params))
    assert out.shape == (b, n_slots, d)
    assert jnp.allclose(out, ref, atol=1e-5, rtol=1e-4), (
        float(jnp.max(jnp.abs(out - ref)))
    )

    # bf16 MXU-operand path (v5e/v6e/v7x perf mode): loose parity sanity check.
    out_bf16 = jax.block_until_ready(
        weighted_attention(inputs, context, params, mxu_dtype=jnp.bfloat16)
    )
    assert float(jnp.max(jnp.abs(out_bf16 - ref))) < 0.1

    print("KERNEL_OK")
</pallas_src>

<mosaic_0001>
module attributes {stable_mosaic.version = 11 : i64} {
  func.func @_weighted_attention_kernel(%arg0: i32, %arg1: memref<2x8x32xf32, #tpu.memory_space<vmem>>, %arg2: memref<2x16x32xf32, #tpu.memory_space<vmem>>, %arg3: memref<32x32xf32, #tpu.memory_space<vmem>>, %arg4: memref<1x32xf32, #tpu.memory_space<vmem>>, %arg5: memref<32x64xf32, #tpu.memory_space<vmem>>, %arg6: memref<1x64xf32, #tpu.memory_space<vmem>>, %arg7: memref<2x8x32xf32, #tpu.memory_space<vmem>>) attributes {dimension_semantics = [#tpu.dimension_semantics<parallel>], iteration_bounds = array<i64: 2>, scalar_prefetch = 0 : i64, scratch_operands = 0 : i64, tpu.core_type = #tpu.core_type<tc>, window_params = [{transform_indices = @transform_0, window_bounds = array<i64: 2, 8, 32>}, {transform_indices = @transform_1, window_bounds = array<i64: 2, 16, 32>}, {pipeline_mode = #tpu.pipeline_mode<synchronous>, transform_indices = @transform_2, window_bounds = array<i64: 32, 32>}, {pipeline_mode = #tpu.pipeline_mode<synchronous>, transform_indices = @transform_3, window_bounds = array<i64: 1, 32>}, {pipeline_mode = #tpu.pipeline_mode<synchronous>, transform_indices = @transform_4, window_bounds = array<i64: 32, 64>}, {pipeline_mode = #tpu.pipeline_mode<synchronous>, transform_indices = @transform_5, window_bounds = array<i64: 1, 64>}, {transform_indices = @transform_6, window_bounds = array<i64: 2, 8, 32>}]} {
    %c0 = arith.constant 0 : index
    %c0_0 = arith.constant 0 : index
    %c0_1 = arith.constant 0 : index
    %0 = vector.load %arg1[%c0, %c0_0, %c0_1] : memref<2x8x32xf32, #tpu.memory_space<vmem>>, vector<2x8x32xf32>
    %c0_2 = arith.constant 0 : index
    %c0_3 = arith.constant 0 : index
    %c0_4 = arith.constant 0 : index
    %1 = vector.load %arg2[%c0_2, %c0_3, %c0_4] : memref<2x16x32xf32, #tpu.memory_space<vmem>>, vector<2x16x32xf32>
    %cst = arith.constant dense<0.000000e+00> : vector<2x8xf32>
    %2 = vector.multi_reduction <add>, %0, %cst [2] : vector<2x8x32xf32> to vector<2x8xf32>
    %3 = vector.shape_cast %2 : vector<2x8xf32> to vector<2x8x1xf32>
    %cst_5 = arith.constant 3.200000e+01 : f32
    %4 = vector.broadcast %cst_5 : f32 to vector<2x8x1xf32>
    %5 = arith.divf %3, %4 : vector<2x8x1xf32>
    %6 = vector.broadcast %5 : vector<2x8x1xf32> to vector<2x8x32xf32>
    %7 = arith.subf %0, %6 : vector<2x8x32xf32>
    %8 = arith.mulf %7, %7 : vector<2x8x32xf32>
    %cst_6 = arith.constant dense<0.000000e+00> : vector<2x8xf32>
    %9 = vector.multi_reduction <add>, %8, %cst_6 [2] : vector<2x8x32xf32> to vector<2x8xf32>
    %10 = vector.shape_cast %9 : vector<2x8xf32> to vector<2x8x1xf32>
    %cst_7 = arith.constant 3.200000e+01 : f32
    %11 = vector.broadcast %cst_7 : f32 to vector<2x8x1xf32>
    %12 = arith.divf %10, %11 : vector<2x8x1xf32>
    %13 = vector.broadcast %5 : vector<2x8x1xf32> to vector<2x8x32xf32>
    %14 = arith.subf %0, %13 : vector<2x8x32xf32>
    %cst_8 = arith.constant 9.99999974E-6 : f32
    %15 = vector.broadcast %cst_8 : f32 to vector<2x8x1xf32>
    %16 = arith.addf %12, %15 : vector<2x8x1xf32>
    %17 = math.rsqrt %16 : vector<2x8x1xf32>
    %18 = vector.broadcast %17 : vector<2x8x1xf32> to vector<2x8x32xf32>
    %19 = arith.mulf %14, %18 : vector<2x8x32xf32>
    %20 = vector.shape_cast %19 : vector<2x8x32xf32> to vector<16x32xf32>
    %cst_9 = arith.constant dense<0.000000e+00> : vector<2x16xf32>
    %21 = vector.multi_reduction <add>, %1, %cst_9 [2] : vector<2x16x32xf32> to vector<2x16xf32>
    %22 = vector.shape_cast %21 : vector<2x16xf32> to vector<2x16x1xf32>
    %cst_10 = arith.constant 3.200000e+01 : f32
    %23 = vector.broadcast %cst_10 : f32 to vector<2x16x1xf32>
    %24 = arith.divf %22, %23 : vector<2x16x1xf32>
    %25 = vector.broadcast %24 : vector<2x16x1xf32> to vector<2x16x32xf32>
    %26 = arith.subf %1, %25 : vector<2x16x32xf32>
    %27 = arith.mulf %26, %26 : vector<2x16x32xf32>
    %cst_11 = arith.constant dense<0.000000e+00> : vector<2x16xf32>
    %28 = vector.multi_reduction <add>, %27, %cst_11 [2] : vector<2x16x32xf32> to vector<2x16xf32>
    %29 = vector.shape_cast %28 : vector<2x16xf32> to vector<2x16x1xf32>
    %cst_12 = arith.constant 3.200000e+01 : f32
    %30 = vector.broadcast %cst_12 : f32 to vector<2x16x1xf32>
    %31 = arith.divf %29, %30 : vector<2x16x1xf32>
    %32 = vector.broadcast %24 : vector<2x16x1xf32> to vector<2x16x32xf32>
    %33 = arith.subf %1, %32 : vector<2x16x32xf32>
    %cst_13 = arith.constant 9.99999974E-6 : f32
    %34 = vector.broadcast %cst_13 : f32 to vector<2x16x1xf32>
    %35 = arith.addf %31, %34 : vector<2x16x1xf32>
    %36 = math.rsqrt %35 : vector<2x16x1xf32>
    %37 = vector.broadcast %36 : vector<2x16x1xf32> to vector<2x16x32xf32>
    %38 = arith.mulf %33, %37 : vector<2x16x32xf32>
    %39 = vector.shape_cast %38 : vector<2x16x32xf32> to vector<32x32xf32>
    %c0_14 = arith.constant 0 : index
    %c0_15 = arith.constant 0 : index
    %40 = vector.load %arg3[%c0_14, %c0_15] : memref<32x32xf32, #tpu.memory_space<vmem>>, vector<32x32xf32>
    %cst_16 = arith.constant dense<0.000000e+00> : vector<16x32xf32>
    %41 = tpu.matmul %20, %40, %cst_16 {dimension_numbers = #tpu.dot_dimension_numbers<[1], [0], [0], [1], [0, 0, 1, 1], [], []>} : vector<16x32xf32>, vector<32x32xf32>, vector<16x32xf32> -> vector<16x32xf32>
    %c0_17 = arith.constant 0 : index
    %c0_18 = arith.constant 0 : index
    %42 = vector.load %arg4[%c0_17, %c0_18] : memref<1x32xf32, #tpu.memory_space<vmem>>, vector<1x32xf32>
    %43 = vector.broadcast %42 : vector<1x32xf32> to vector<16x32xf32>
    %44 = arith.addf %41, %43 : vector<16x32xf32>
    %c0_19 = arith.constant 0 : index
    %c0_20 = arith.constant 0 : index
    %45 = vector.load %arg5[%c0_19, %c0_20] : memref<32x64xf32, #tpu.memory_space<vmem>>, vector<32x64xf32>
    %cst_21 = arith.constant dense<0.000000e+00> : vector<32x64xf32>
    %46 = tpu.matmul %39, %45, %cst_21 {dimension_numbers = #tpu.dot_dimension_numbers<[1], [0], [0], [1], [0, 0, 1, 1], [], []>} : vector<32x32xf32>, vector<32x64xf32>, vector<32x64xf32> -> vector<32x64xf32>
    %c0_22 = arith.constant 0 : index
    %c0_23 = arith.constant 0 : index
    %47 = vector.load %arg6[%c0_22, %c0_23] : memref<1x64xf32, #tpu.memory_space<vmem>>, vector<1x64xf32>
    %48 = vector.broadcast %47 : vector<1x64xf32> to vector<32x64xf32>
    %49 = arith.addf %46, %48 : vector<32x64xf32>
    %50 = vector.extract_strided_slice %49 {offsets = [0, 0], sizes = [32, 32], strides = [1, 1]} : vector<32x64xf32> to vector<32x32xf32>
    %51 = vector.extract_strided_slice %49 {offsets = [0, 32], sizes = [32, 32], strides = [1, 1]} : vector<32x64xf32> to vector<32x32xf32>
    %52 = vector.shape_cast %44 : vector<16x32xf32> to vector<2x8x32xf32>
    %53 = vector.shape_cast %50 : vector<32x32xf32> to vector<2x16x32xf32>
    %54 = vector.shape_cast %51 : vector<32x32xf32> to vector<2x16x32xf32>
    "tpu.trace_start"() <{level = 10 : i32, message = "bid,bjd->bij"}> : () -> ()
    %cst_24 = arith.constant dense<0.000000e+00> : vector<2x8x16xf32>
    %55 = tpu.matmul %52, %53, %cst_24 {dimension_numbers = #tpu.dot_dimension_numbers<[2], [2], [1], [1], [0, 0, 0, 1, 1, 1], [0], [0]>} : vector<2x8x32xf32>, vector<2x16x32xf32>, vector<2x8x16xf32> -> vector<2x8x16xf32>
    "tpu.trace_stop"() : () -> ()
    %cst_25 = arith.constant dense<0xFF800000> : vector<2x16xf32>
    %56 = vector.multi_reduction <maximumf>, %55, %cst_25 [1] : vector<2x8x16xf32> to vector<2x16xf32>
    %57 = vector.shape_cast %56 : vector<2x16xf32> to vector<2x1x16xf32>
    %58 = vector.broadcast %57 : vector<2x1x16xf32> to vector<2x8x16xf32>
    %59 = arith.subf %55, %58 : vector<2x8x16xf32>
    %60 = math.exp %59 : vector<2x8x16xf32>
    %cst_26 = arith.constant dense<0.000000e+00> : vector<2x16xf32>
    %61 = vector.multi_reduction <add>, %60, %cst_26 [1] : vector<2x8x16xf32> to vector<2x16xf32>
    %62 = vector.shape_cast %61 : vector<2x16xf32> to vector<2x1x16xf32>
    %63 = tpu.reciprocal %62 : vector<2x1x16xf32> -> vector<2x1x16xf32>
    %64 = vector.broadcast %63 : vector<2x1x16xf32> to vector<2x8x16xf32>
    %65 = arith.mulf %60, %64 : vector<2x8x16xf32>
    %cst_27 = arith.constant 9.99999993E-9 : f32
    %66 = vector.broadcast %cst_27 : f32 to vector<2x8x16xf32>
    %67 = arith.addf %65, %66 : vector<2x8x16xf32>
    %cst_28 = arith.constant dense<0.000000e+00> : vector<2x8xf32>
    %68 = vector.multi_reduction <add>, %67, %cst_28 [2] : vector<2x8x16xf32> to vector<2x8xf32>
    %69 = vector.shape_cast %68 : vector<2x8xf32> to vector<2x8x1xf32>
    "tpu.trace_start"() <{level = 10 : i32, message = "bij,bjd->bid"}> : () -> ()
    %cst_29 = arith.constant dense<0.000000e+00> : vector<2x8x32xf32>
    %70 = tpu.matmul %67, %54, %cst_29 {dimension_numbers = #tpu.dot_dimension_numbers<[2], [1], [1], [2], [0, 0, 0, 1, 1, 2], [0], [0]>} : vector<2x8x16xf32>, vector<2x16x32xf32>, vector<2x8x32xf32> -> vector<2x8x32xf32>
    "tpu.trace_stop"() : () -> ()
    %71 = tpu.reciprocal %69 : vector<2x8x1xf32> -> vector<2x8x1xf32>
    %72 = vector.broadcast %71 : vector<2x8x1xf32> to vector<2x8x32xf32>
    %73 = arith.mulf %70, %72 : vector<2x8x32xf32>
    %c0_30 = arith.constant 0 : index
    %c0_31 = arith.constant 0 : index
    %c0_32 = arith.constant 0 : index
    %74 = vector.load %arg7[%c0_30, %c0_31, %c0_32] : memref<2x8x32xf32, #tpu.memory_space<vmem>>, vector<2x8x32xf32>
    tpu.vector_store %arg7[%c0_30, %c0_31, %c0_32], %73 {strides = array<i32>} : memref<2x8x32xf32, #tpu.memory_space<vmem>>, vector<2x8x32xf32>,
    return
  }
  func.func @transform_0(%arg0: i32) -> (i32, i32, i32) {
    %c0_i32 = arith.constant 0 : i32
    %c0_i32_0 = arith.constant 0 : i32
    %c0_i32_1 = arith.constant 0 : i32
    return %arg0, %c0_i32, %c0_i32_0 : i32, i32, i32
  }
  func.func @transform_1(%arg0: i32) -> (i32, i32, i32) {
    %c0_i32 = arith.constant 0 : i32
    %c0_i32_0 = arith.constant 0 : i32
    %c0_i32_1 = arith.constant 0 : i32
    return %arg0, %c0_i32, %c0_i32_0 : i32, i32, i32
  }
  func.func @transform_2(%arg0: i32) -> (i32, i32) {
    %c0_i32 = arith.constant 0 : i32
    %c0_i32_0 = arith.constant 0 : i32
    %c0_i32_1 = arith.constant 0 : i32
    return %c0_i32, %c0_i32_0 : i32, i32
  }
  func.func @transform_3(%arg0: i32) -> (i32, i32) {
    %c0_i32 = arith.constant 0 : i32
    %c0_i32_0 = arith.constant 0 : i32
    %c0_i32_1 = arith.constant 0 : i32
    return %c0_i32, %c0_i32_0 : i32, i32
  }
  func.func @transform_4(%arg0: i32) -> (i32, i32) {
    %c0_i32 = arith.constant 0 : i32
    %c0_i32_0 = arith.constant 0 : i32
    %c0_i32_1 = arith.constant 0 : i32
    return %c0_i32, %c0_i32_0 : i32, i32
  }
  func.func @transform_5(%arg0: i32) -> (i32, i32) {
    %c0_i32 = arith.constant 0 : i32
    %c0_i32_0 = arith.constant 0 : i32
    %c0_i32_1 = arith.constant 0 : i32
    return %c0_i32, %c0_i32_0 : i32, i32
  }
  func.func @transform_6(%arg0: i32) -> (i32, i32, i32) {
    %c0_i32 = arith.constant 0 : i32
    %c0_i32_0 = arith.constant 0 : i32
    %c0_i32_1 = arith.constant 0 : i32
    return %arg0, %c0_i32, %c0_i32_0 : i32, i32, i32
  }
}

</mosaic_0001>

<bundles_post_ra>
// kernel: tpu_custom_call.1
= control target key start
LH: loop header
LB: loop body
LE: loop exit
PB: predicated region body
PF: predicated region fallthrough
CT: control target
= control target key end

     0   :  { %s2020_s0 = inlined_call_operand.hbm [shape: f32[4,8,32], index: 0, kind: input, shape index: {}]   ;;  %s2021_s1 = inlined_call_operand.hbm [shape: f32[4,16,32], index: 1, kind: input, shape index: {}]   ;;  %s2022_s2 = inlined_call_operand.hbm [shape: f32[32,32], index: 2, kind: input, shape index: {}]   ;;  %s2023_s3 = inlined_call_operand.vmem [shape: f32[1,32], index: 3, kind: input, shape index: {}]   ;;  %s2024_s4 = inlined_call_operand.hbm [shape: f32[32,64], index: 4, kind: input, shape index: {}]   ;;  %s2025_s5 = inlined_call_operand.vmem [shape: f32[1,64], index: 5, kind: input, shape index: {}]   ;;  %s2026_s6 = inlined_call_operand.hbm [shape: f32[4,8,32], index: 6, kind: output, shape index: {}]  }
   0x1   :  { %2034 = sst [smem:[#allocation17_spill]] %s2020_s0 }
   0x2   :  { %2035 = sst [smem:[#allocation18_spill]] %s2022_s2 }
   0x3   :  { %2036 = sst [smem:[#allocation19_spill]] %s2024_s4 }
   0x4   :  { %11 = vsyncpa [#allocation3], 0 }
   0x5   :  { %13 = vsyncpa [#allocation3 + $0x1], 0 }
   0x6   :  { %14 = vsyncpa [#allocation6], 0 }
   0x7   :  { %16 = vsyncpa [#allocation6 + $0x1], 0 }
   0x8   :  { %17 = vsyncpa [#allocation9], 0 }
   0x9   :  { %18 = vsyncpa [#allocation4], 0 }
   0xa   :  { %20 = vsyncpa [#allocation4 + $0x1], 0  ;;  %s1637_s21 = smov 0   ;;  %s1639_s22 = smov 0  }
   0xb   :  { %s1641_s23 = smov 0   ;;  %s1643_s24 = smov 0  }
   0xc LB: > { %s1658_s25 = sadd.s32 4294967295, %s1587_s24   ;;  %s1127_s26 = sadd.s32 4294967294, %s1587_s24   ;;  %s1587_s24 = sphi %s1643_s24, %s2065_s24   ;;  %s1583_s23 = sphi %s1641_s23, %s2064_s23   ;;  %s1579_s22 = sphi %s1639_s22, %s2063_s22   ;;  %s1575_s21 = sphi %s1637_s21, %s2062_s21  }
   0xd   : > { %p46_p0 = scmp.ne.s32.totalorder %s1579_s22, %s1575_s21  ;;  %p2027_p1 = scmp.eq.s32.totalorder %s1658_s25, 0 }
   0xe   : > { %p186_p3 = scmp.eq.s32.totalorder %s1127_s26, 1  ;;  %p1128_p5 = scmp.ge.s32.totalorder %s1587_s24, 1 }
   0xf   : > { %p1667_p4 = por %p2027_p1, %p46_p0  ;;  %p193_p7 = scmp.lt.s32.totalorder %s1587_s24, 3 }
  0x10   : > { %p1672_p6 = por %p186_p3, %p46_p0  ;;  %s1589_s30 = smov [#allocation7]  }
  0x11   : > { %s2037_s27 = scalar_select %p1667_p4, 1, 0 }
  0x12   : > { %s2038_s28 = scalar_select %p1672_p6, 1, 0 }
  0x13   : > { %p1677_p8 = pnand %p1128_p5, %p193_p7  ;;  %s205_s7 = sshll.u32 %s1589_s30, 4  ;;  %s1681_s7 = int_to_ptr.vmem [resolvable:$true] %s205_s7 }
  0x14   : > { %s1590_s9 = smov [#allocation8]   ;;  %s2041_s2 = sld [smem:[#allocation18_spill]] }
  0x15   : > { %p1293_p9 = pneg %p1677_p8  ;;  %s221_s10 = sshll.u32 %s1590_s9, 4  ;;  %s1692_s10 = int_to_ptr.vmem [resolvable:$true] %s221_s10 }
  0x17   : > { %p1688_p11 = pnand %p1293_p9, %p2027_p1 }
  0x19   : > { %p1395_p13 = pneg %p1688_p11 }
  0x1a   : > { %s1393_s13 = scalar_lea.hbm %s2041_s2, 512 }
  0x1b   : > { %p1394_p12 = scmp.ne.s32.totalorder %s2041_s2, %s1393_s13  ;;  %p1400_p5 = scmp.lt.u32.totalorder %s1393_s13, %s2041_s2 }
  0x1d   : > { %p1396_p0 = pnand %p1395_p13, %p1394_p12 }
  0x1f   : > { %p1397_p3 = pneg %p1396_p0 }
  0x21   : > { %p1402_p7 = pnand %p1400_p5, %p1397_p3 }
  0x23   : > { %1405 = shalt.err (!%p1402_p7)
}
  0x24   : > { %s1406_s18 = scalar_lea.vmem %s1681_s7, 512  ;;  %p1414_p2 = scmp.lt.s32.totalorder %s1681_s7, %s1681_s7 }
  0x25   : > { %p1407_p9 = scmp.ne.s32.totalorder %s1681_s7, %s1406_s18  ;;  %p1415_p12 = scmp.lt.s32.totalorder %s1406_s18, %s1406_s18 }
  0x27   : > { %p1409_p10 = pnand %p1407_p9, %p1395_p13  ;;  %p1416_p0 = por %p1415_p12, %p1414_p2 }
  0x29   : > { %p1410_p1 = pneg %p1409_p10 }
  0x2b   : > { %p1417_p6 = pnand %p1416_p0, %p1410_p1 }
  0x2d   : > { %1420 = shalt.err (!%p1417_p6)
}
  0x2e   : > { %s2028_s19 = smov 128   ;;  %s2030_s20 = smov 8  }
  0x2f   : > { %1296 = dma.hbm_to_vmem [thread:$0]  (!%p1688_p11), %s2041_s2, 512, %s1681_s7, [#allocation6], %s2028_s19, %s2028_s19, %s2030_s20  }
  0x30   : > { %s2042_s4 = sld [smem:[#allocation19_spill]] }
  0x36   : > { %s1421_s12 = scalar_lea.hbm %s2042_s4, 512 }
  0x37   : > { %p1422_p1 = scmp.ne.s32.totalorder %s2042_s4, %s1421_s12  ;;  %p1428_p10 = scmp.lt.u32.totalorder %s1421_s12, %s2042_s4 }
  0x39   : > { %p1424_p2 = pnand %p1422_p1, %p1395_p13 }
  0x3b   : > { %p1425_p6 = pneg %p1424_p2 }
  0x3d   : > { %p1430_p3 = pnand %p1428_p10, %p1425_p6 }
  0x3f   : > { %1433 = shalt.err (!%p1430_p3)
}
  0x40   : > { %s1434_s7 = scalar_lea.vmem %s1692_s10, 512  ;;  %p1442_p12 = scmp.lt.s32.totalorder %s1692_s10, %s1692_s10 }
  0x41   : > { %p1435_p5 = scmp.ne.s32.totalorder %s1692_s10, %s1434_s7  ;;  %p1443_p0 = scmp.lt.s32.totalorder %s1434_s7, %s1434_s7 }
  0x43   : > { %p1437_p7 = pnand %p1435_p5, %p1395_p13  ;;  %p1444_p1 = por %p1443_p0, %p1442_p12 }
  0x45   : > { %p1438_p9 = pneg %p1437_p7 }
  0x47   : > { %p1445_p2 = pnand %p1444_p1, %p1438_p9 }
  0x49   : > { %1448 = shalt.err (!%p1445_p2)
}
  0x4a   : > { %1299 = dma.hbm_to_vmem [thread:$0]  (!%p1688_p11), %s2042_s4, 512, %s1692_s10, [#allocation9], %s2028_s19, %s2028_s19, %s2030_s20  }
  0x4b   : > { %s1753_s8 = sadd.s32 1, %s1587_s24   ;;  %s33_s26 = sadd.s32 1, %s1583_s23 }
  0x4c   : > { %s30_s30 = ssub.s32 %s1587_s24, %s1753_s8  ;;  %p40_p13 = scmp.ne.s32.totalorder %s1583_s23, %s1579_s22 }
  0x4d   : > { %p31_p6 = scmp.eq.s32.totalorder %s30_s30, 0  ;;  %p41_p10 = scmp.eq.s32.totalorder %s1587_s24, 0 }
  0x4e   : > { %p2043_p3 = scmp.eq.s32.totalorder %s1658_s25, 1  ;;  %p1313_p7 = scmp.lt.s32.totalorder %s1587_s24, 2 }
  0x4f   : > { %s1769_s11 = scalar_select %p31_p6, %s1583_s23, %s33_s26  }
  0x50   : > { %p1763_p5 = por %p2043_p3, %p40_p13  ;;  %p42_p9 = por %p41_p10, %p40_p13 }
  0x51   : > { %2045 = sst [smem:[#allocation16_spill]] %s1769_s11  ;;  %s1772_s12 = sand.u32 1, %s1583_s23  }
  0x52   : > { %s2044_s9 = scalar_select %p1763_p5, 1, 0 }
  0x53   : > { %s1132_s10 = sshll.u32 %s1772_s12, 4  ;;  %s1166_s13 = sshll.u32 %s1587_s24, 8 }
  0x54   : > { %s2046_s0 = sld [smem:[#allocation17_spill]]  ;;  %s242_s7 = scalar_lea.vmem [#allocation2], %s1132_s10 }
  0x55   : > { %s249_s17 = sshll.u32 %s242_s7, 4  ;;  %p1783_p11 = pnand %p1313_p7, %p42_p9  ;;  %s1781_s17 = int_to_ptr.vmem [resolvable:$true] %s249_s17 }
  0x56   : > { %s1135_s30 = sshll.u32 %s1772_s12, 5  ;;  %s239_s19 = scalar_lea.sflag [#allocation3], %s1772_s12 }
  0x57   : > { %p1451_p0 = pneg %p1783_p11 }
  0x5a   : > { %s1779_s16 = scalar_lea.hbm %s2046_s0, %s1166_s13  ;;  %s1454_s15 = scalar_lea.hbm %s2046_s0, 512 }
  0x5b   : > { %s1449_s14 = scalar_lea.hbm %s1779_s16, 256  ;;  %p1455_p13 = scmp.lt.u32.totalorder %s1779_s16, %s2046_s0 }
  0x5c   : > { %p1450_p12 = scmp.ne.s32.totalorder %s1779_s16, %s1449_s14  ;;  %p1456_p6 = scmp.lt.u32.totalorder %s1454_s15, %s1449_s14 }
  0x5d   : > { %p1458_p3 = scmp.lt.u32.totalorder %s1449_s14, %s1779_s16 }
  0x5e   : > { %p1452_p1 = pnand %p1451_p0, %p1450_p12  ;;  %p1457_p10 = por %p1456_p6, %p1455_p13 }
  0x60   : > { %p1453_p2 = pneg %p1452_p1  ;;  %p1459_p7 = por %p1458_p3, %p1457_p10 }
  0x62   : > { %p1460_p9 = pnand %p1459_p7, %p1453_p2 }
  0x64   : > { %1463 = shalt.err (!%p1460_p9)
}
  0x65   : > { %s1464_s26 = scalar_lea.vmem %s1781_s17, 256  ;;  %s1593_s10 = smov [#allocation2]  }
  0x66   : > { %p1465_p12 = scmp.ne.s32.totalorder %s1781_s17, %s1464_s26  ;;  %s1469_s13 = sshll.u32 %s1593_s10, 4  ;;  %s1470_s13 = int_to_ptr.vmem [resolvable:$false] %s1469_s13 }
  0x67   : > { %s1471_s20 = scalar_lea.vmem %s1470_s13, 512  ;;  %p1472_p4 = scmp.lt.s32.totalorder %s1781_s17, %s1470_s13 }
  0x68   : > { %p1467_p1 = pnand %p1465_p12, %p1451_p0  ;;  %p1473_p13 = scmp.lt.s32.totalorder %s1471_s20, %s1464_s26 }
  0x6a   : > { %p1468_p5 = pneg %p1467_p1  ;;  %p1474_p6 = por %p1473_p13, %p1472_p4 }
  0x6c   : > { %p1475_p10 = pnand %p1474_p6, %p1468_p5 }
  0x6e   : > { %1478 = shalt.err (!%p1475_p10)
}
  0x6f   : > { %s2048_s14 = smov 8   ;;  %s2049_s15 = smov 128  }
  0x70   : > { %1303 = dma.hbm_to_vmem [thread:$0]  (!%p1783_p11), %s1779_s16, 256, %s1781_s17, %s239_s19, %s2049_s15, %s2049_s15, %s2048_s14  }
  0x71   : > { %s1168_s7 = sshll.u32 %s1587_s24, 9  ;;  %s263_s20 = scalar_lea.vmem [#allocation5], %s1135_s30 }
  0x72   : > { %s1824_s13 = scalar_lea.hbm %s2021_s1, %s1168_s7  ;;  %s271_s0 = sshll.u32 %s263_s20, 4  ;;  %s1828_s0 = int_to_ptr.vmem [resolvable:$true] %s271_s0 }
  0x73   : > { %s2050_s2 = sand.u32 1, %s1587_s24   ;;  %s1479_s11 = scalar_lea.hbm %s1824_s13, 512 }
  0x74   : > { %s1832_s4 = scalar_lea.sflag [#allocation6], %s2050_s2  ;;  %p1480_p4 = scmp.ne.s32.totalorder %s1824_s13, %s1479_s11 }
  0x75   : > { %s1484_s12 = scalar_lea.hbm %s2021_s1, 1024  ;;  %p1485_p3 = scmp.lt.u32.totalorder %s1824_s13, %s2021_s1 }
  0x76   : > { %p1482_p5 = pnand %p1480_p4, %p1451_p0  ;;  %p1486_p7 = scmp.lt.u32.totalorder %s1484_s12, %s1479_s11 }
  0x77   : > { %p1488_p12 = scmp.lt.u32.totalorder %s1479_s11, %s1824_s13 }
  0x78   : > { %p1483_p2 = pneg %p1482_p5  ;;  %p1487_p9 = por %p1486_p7, %p1485_p3 }
  0x7a   : > { %p1489_p1 = por %p1488_p12, %p1487_p9 }
  0x7c   : > { %p1490_p13 = pnand %p1489_p1, %p1483_p2 }
  0x7e   : > { %1493 = shalt.err (!%p1490_p13)
}
  0x7f   : > { %s1494_s2 = scalar_lea.vmem %s1828_s0, 512  ;;  %s1594_s30 = smov [#allocation5]  }
  0x80   : > { %p1495_p6 = scmp.ne.s32.totalorder %s1828_s0, %s1494_s2  ;;  %s1499_s10 = sshll.u32 %s1594_s30, 4  ;;  %s1500_s10 = int_to_ptr.vmem [resolvable:$false] %s1499_s10 }
  0x81   : > { %s1501_s26 = scalar_lea.vmem %s1500_s10, 1024  ;;  %p1502_p5 = scmp.lt.s32.totalorder %s1828_s0, %s1500_s10 }
  0x82   : > { %p1497_p10 = pnand %p1495_p6, %p1451_p0  ;;  %p1503_p3 = scmp.lt.s32.totalorder %s1501_s26, %s1494_s2 }
  0x84   : > { %p1498_p4 = pneg %p1497_p10  ;;  %p1504_p7 = por %p1503_p3, %p1502_p5 }
  0x86   : > { %p1505_p9 = pnand %p1504_p7, %p1498_p4 }
  0x88   : > { %1508 = shalt.err (!%p1505_p9)
}
  0x89   : > { %1306 = dma.hbm_to_vmem [thread:$0]  (!%p1783_p11), %s1824_s13, 512, %s1828_s0, %s1832_s4, %s2049_s15, %s2049_s15, %s2048_s14  }
  0x8a   : > { %283 = sbr.rel (%p1677_p8) target bundleno = 1194 (0x4aa), region = 44  ;;  %s1864_s11 = sand.u32 (!%p1677_p8), 1, %s1579_s22  }
  0x8b   : > { %s1140_s20 = sshll.u32 (!%p1677_p8), %s1864_s11, 4  ;;  %s286_s19 = scalar_lea.sflag (!%p1677_p8), [#allocation3], %s1864_s11 }
  0x8c   : > { %s289_s18 = scalar_lea.vmem (!%p1677_p8), [#allocation2], %s1140_s20  ;;  %p2051_p0 = scmp.ne.s32.totalorder (!%p1677_p8), %s2037_s27, 0 }
  0x91   : > { %1554 = dma.done.wait (%p2051_p0), %s286_s19, 256  }
  0x92   : > { %1556 = vsyncadd (%p2051_p0), %s286_s19, 4294967040  ;;  %s294_s0 = sand.u32 1, %s1658_s25   ;;  %s1141_s4 = sshll.u32 %s1864_s11, 5 }
  0x93   : > { %s295_s29 = scalar_lea.sflag [#allocation6], %s294_s0  ;;  %s298_s14 = scalar_lea.vmem [#allocation5], %s1141_s4 }
  0x94   : > { %1558 = dma.done.wait (%p2051_p0), %s295_s29, 512  }
  0x95   : > { %1560 = vsyncadd (%p2051_p0), %s295_s29, 4294966784  ;;  %p2052_p8 = scmp.eq.s32.totalorder %s1658_s25, 0 }
  0x97   : > { %1562 = dma.done.wait (%p2052_p8), [#allocation6], 512   ;;  %p2053_p11 = pmov %p2052_p8 }
  0x98   : > { %p2054_p2 = pmov %p2052_p8 }
  0x99   : > { %1564 = vsyncadd (%p2053_p11), [#allocation6], 4294966784 }
  0x9a   : > { %1566 = dma.done.wait (%p2054_p2), [#allocation9], 512   ;;  %p2055_p12 = pmov %p2054_p2 }
  0x9b   : > { %vm349_vm0 = vcmask 261120   ;;  %v345_v0 = vld [vmem:[%s298_s14] sm:$0xff]  ;;  %v347_v1 = vld [vmem:[%s298_s14 + $0x10] sm:$0xff]  ;;  %v346_v2 = vld [vmem:[%s298_s14 + $0x8] sm:$0xff]  ;;  %vm1596_vm1 = vmmov 0   ;;  %s1598_s13 = smov 96  }
  0x9c   : > { %1568 = vsyncadd (%p2055_p12), [#allocation9], 4294966784  ;;  %v377_v3 = vsel %vm349_vm0, %v345_v0, 0.0  ;;  %v383_v4 = vsel %vm349_vm0, %v347_v1, 0.0  ;;  %v348_v5 = vld [vmem:[%s298_s14 + $0x18] sm:$0xff]  ;;  %v380_v6 = vsel %vm349_vm0, %v346_v2, 0.0 }
  0x9d   : > { %378 = vadd.xlane.f32.xlu0 %v377_v3  ;;  %384 = vadd.xlane.f32.xlu1 %v383_v4  ;;  %v386_v7 = vsel %vm349_vm0, %v348_v5, 0.0  ;;  %v343_v8 = vld [vmem:[%s289_s18] sm:$0xff]  ;;  %v344_v9 = vld [vmem:[%s289_s18 + $0x8] sm:$0xff]  ;;  %vm1943_vm2 = vmpackc.low %vm349_vm0, %vm349_vm0  ;;  %vm787_vm3 = vcmask 130048   ;;  %s339_s17 = scalar_lea.vmem [#allocation10], %s1140_s20  ;;  %s1169_s2 = sshll.u32 %s1658_s25, 8 }
  0x9e   : > { %v350_v10 = vsel %vm349_vm0, %v343_v8, 0.0  ;;  %v353_v11 = vsel %vm349_vm0, %v344_v9, 0.0  ;;  %v521_v42 = vld [vmem:[#allocation8] sm:$0xff]  ;;  %v522_v43 = vld [vmem:[#allocation8 + $0x8] sm:$0xff]  ;;  %v523_v45 = vld [vmem:[#allocation8 + $0x10] sm:$0xff]  ;;  %s1012_s7 = sshll.u32 %s339_s17, 4  ;;  %s1975_s26 = scalar_lea.hbm %s2026_s6, %s1169_s2  ;;  %s1970_s7 = int_to_ptr.vmem [resolvable:$true] %s1012_s7 }
  0x9f   : > { %v1257_v44 = vpack.c.bf16 %v522_v43, %v521_v42  ;;  %v524_v46 = vld [vmem:[#allocation8 + $0x18] sm:$0xff]  ;;  %v429_v48 = vld [vmem:[#allocation7] sm:$0xff]  ;;  %v430_v49 = vld [vmem:[#allocation7 + $0x8] sm:$0xff]  ;;  %s999_s20 = scalar_lea.sflag [#allocation4], %s1864_s11  ;;  %s1509_s25 = scalar_lea.vmem %s1970_s7, 256 }
  0xa0   : > { %v1261_v47 = vpack.c.bf16 %v524_v46, %v523_v45  ;;  %v1249_v50 = vpack.c.bf16 %v430_v49, %v429_v48  ;;  %v431_v51 = vld [vmem:[#allocation7 + $0x10] sm:$0xff]  ;;  %v432_v52 = vld [vmem:[#allocation7 + $0x18] sm:$0xff]  ;;  %p1510_p1 = scmp.ne.s32.totalorder %s1970_s7, %s1509_s25  ;;  %p2058_p13 = scmp.ne.s32.totalorder %s2044_s9, 0 }
  0xa1   : > { %381 = vadd.xlane.f32.xlu0 %v380_v6  ;;  %387 = vadd.xlane.f32.xlu1 %v386_v7  ;;  %v1253_v53 = vpack.c.bf16 %v432_v52, %v431_v51  ;;  %s1599_s19 = smov [#allocation10]  }
  0xa2   : > { %1258 = vmatprep.subr.bf16.mxu1 %v1257_v44  ;;  %1250 = vmatprep.subr.bf16.mxu0 %v1249_v50  ;;  %p1511_p6 = pnand %p1510_p1, %p2058_p13  ;;  %s1513_s18 = sshll.u32 %s1599_s19, 4  ;;  %s1514_s18 = int_to_ptr.vmem [resolvable:$false] %s1513_s18 }
  0xa3   : > { %1260 = vmatpush3.bf16.msra.mxu1 %v1257_v44  ;;  %1252 = vmatpush3.bf16.msra.mxu0 %v1249_v50  ;;  %s1515_s0 = scalar_lea.vmem %s1514_s18, 512  ;;  %p1516_p4 = scmp.lt.s32.totalorder %s1970_s7, %s1514_s18 }
  0xa4   : > { %1262 = vmatprep.subr.bf16.mxu1 %v1261_v47  ;;  %1254 = vmatprep.subr.bf16.mxu0 %v1253_v53  ;;  %p1512_p10 = pneg %p1511_p6  ;;  %p1517_p5 = scmp.lt.s32.totalorder %s1515_s0, %s1509_s25 }
  0xa5   : > { %351 = vadd.xlane.f32.xlu0 %v350_v10  ;;  %354 = vadd.xlane.f32.xlu1 %v353_v11 }
  0xa6   : > { %p1518_p3 = por %p1517_p5, %p1516_p4 }
  0xa7   : > { %1264 = vmatpush3.bf16.msra.mxu1 %v1261_v47  ;;  %1256 = vmatpush3.bf16.msra.mxu0 %v1253_v53 }
  0xa8   : > { %p1519_p7 = pnand %p1518_p3, %p1512_p10 }
 0x12a   : > { %v379_v12 = vpop.xlane.xlu0 %378  ;;  %v385_v13 = vpop.xlane.xlu1 %384 }
 0x12b   : > { %v389_v14 = vmul.f32 0.03125, %v379_v12  ;;  %v391_v15 = vmul.f32 0.03125, %v385_v13 }
 0x12d   : > { %v1894_v16 = vsub.f32 %v345_v0, %v389_v14  ;;  %v1896_v17 = vsub.f32 %v347_v1, %v391_v15 }
 0x12e   : > { %v382_v18 = vpop.xlane.xlu0 %381  ;;  %v388_v19 = vpop.xlane.xlu1 %387 }
 0x12f   : > { %v390_v20 = vmul.f32 0.03125, %v382_v18  ;;  %v392_v21 = vmul.f32 0.03125, %v388_v19  ;;  %v397_v22 = vmul.f32 %v1894_v16, %v1894_v16  ;;  %v399_v23 = vmul.f32 %v1896_v17, %v1896_v17 }
 0x131   : > { %v1902_v24 = vsub.f32 %v346_v2, %v390_v20  ;;  %v1904_v25 = vsub.f32 %v348_v5, %v392_v21  ;;  %v401_v26 = vsel %vm349_vm0, %v397_v22, 0.0  ;;  %v407_v29 = vsel %vm349_vm0, %v399_v23, 0.0  ;;  %v1148_v22 = vld [vmem:[%s2025_s5] ss:$0 sm:$0xff] }
 0x132   : > { %402 = vadd.xlane.f32.xlu0 %v401_v26  ;;  %v352_v27 = vpop.xlane.xlu0 %351  ;;  %v355_v28 = vpop.xlane.xlu1 %354  ;;  %v1597_v21 = vmov 0.0  }
 0x133   : > { %v357_v30 = vmul.f32 0.03125, %v352_v27  ;;  %v398_v31 = vmul.f32 %v1902_v24, %v1902_v24  ;;  %v358_v32 = vmul.f32 0.03125, %v355_v28  ;;  %v400_v33 = vmul.f32 %v1904_v25, %v1904_v25 }
 0x135   : > { %v1912_v34 = vsub.f32 %v343_v8, %v357_v30  ;;  %v404_v35 = vsel %vm349_vm0, %v398_v31, 0.0  ;;  %v1915_v36 = vsub.f32 %v344_v9, %v358_v32  ;;  %v410_v37 = vsel %vm349_vm0, %v400_v33, 0.0 }
 0x136   : > { %405 = vadd.xlane.f32.xlu1 %v404_v35  ;;  %408 = vadd.xlane.f32.xlu0 %v407_v29 }
 0x137   : > { %v361_v38 = vmul.f32 %v1912_v34, %v1912_v34  ;;  %v362_v39 = vmul.f32 %v1915_v36, %v1915_v36 }
 0x139   : > { %v363_v40 = vsel %vm349_vm0, %v361_v38, 0.0  ;;  %v366_v41 = vsel %vm349_vm0, %v362_v39, 0.0 }
 0x13a   : > { %411 = vadd.xlane.f32.xlu1 %v410_v37  ;;  %364 = vadd.xlane.f32.xlu0 %v363_v40 }
 0x13e   : > { %367 = vadd.xlane.f32.xlu1 %v366_v41 }
 0x1bf   : > { %v403_v54 = vpop.xlane.xlu0 %402 }
 0x1c0   : > { %v413_v55 = vmul.f32 0.03125, %v403_v54 }
 0x1c2   : > { %v417_v56 = vadd.f32 1e-05, %v413_v55 }
 0x1c3   : > { %v406_v57 = vpop.xlane.xlu1 %405  ;;  %v409_v58 = vpop.xlane.xlu0 %408 }
 0x1c4   : > { %1369 = vrsqrt.f32 %v417_v56  ;;  %v414_v59 = vmul.f32 0.03125, %v406_v57  ;;  %v415_v60 = vmul.f32 0.03125, %v409_v58 }
 0x1c6   : > { %v418_v61 = vadd.f32 1e-05, %v414_v59  ;;  %v419_v62 = vadd.f32 1e-05, %v415_v60 }
 0x1c7   : > { %v412_v63 = vpop.xlane.xlu1 %411  ;;  %v365_v0 = vpop.xlane.xlu0 %364 }
 0x1c8   : > { %1371 = vrsqrt.f32 %v418_v61  ;;  %v416_v1 = vmul.f32 0.03125, %v412_v63  ;;  %v369_v2 = vmul.f32 0.03125, %v365_v0 }
 0x1c9   : > { %1373 = vrsqrt.f32 %v419_v62 }
 0x1ca   : > { %v420_v3 = vadd.f32 1e-05, %v416_v1  ;;  %v371_v4 = vadd.f32 1e-05, %v369_v2 }
 0x1cb   : > { %v368_v5 = vpop.xlane.xlu1 %367 }
 0x1cc   : > { %1375 = vrsqrt.f32 %v420_v3  ;;  %v370_v6 = vmul.f32 0.03125, %v368_v5 }
 0x1cd   : > { %1377 = vrsqrt.f32 %v371_v4 }
 0x1ce   : > { %v1370_v7 = vpop.eup %1369  ;;  %v372_v8 = vadd.f32 1e-05, %v370_v6 }
 0x1cf   : > { %v425_v9 = vmul.f32 %v1370_v7, %v1894_v16 }
 0x1d0   : > { %1379 = vrsqrt.f32 %v372_v8 }
 0x1d1   : > { %1215 = vmatprep.mubr.msk.f32.mxu1 %vm349_vm0, %v425_v9 }
 0x1d2   : > { %v1372_v10 = vpop.eup %1371 }
 0x1d3   : > { %v1374_v11 = vpop.eup %1373  ;;  %v426_v12 = vmul.f32 %v1372_v10, %v1902_v24 }
 0x1d4   : > { %v427_v13 = vmul.f32 %v1374_v11, %v1896_v17  ;;  %v1595_v17 = vmov 0.0|0.0  }
 0x1d5   : > { %1216 = vmatmul.mubr.msk.f32.vlgmr.msra.gmra.mrb[0].mxu1 %vm349_vm0, %v426_v12  ;;  %1265 = vmatprep.subr.bf16.mxu0 %v1595_v17 }
 0x1d6   : > { %v1376_v14 = vpop.eup %1375  ;;  %1218 = vmatprep.mubr.msk.f32.mxu1 %vm349_vm0, %v427_v13  ;;  %1269 = vmatprep.subr.bf16.mxu1 %v1595_v17 }
 0x1d7   : > { %v1378_v15 = vpop.eup %1377  ;;  %v428_v18 = vmul.f32 %v1376_v14, %v1904_v25 }
 0x1d8   : > { %v375_v19 = vmul.f32 %v1378_v15, %v1912_v34  ;;  %v1145_v34 = vld [vmem:[%s2023_s3] ss:$0 sm:$0xff] }
 0x1d9   : > { %1219 = vmatmul.mubr.msk.f32.gmra.mrb[2].mxu1 %vm349_vm0, %v428_v18 }
 0x1da   : > { %v1380_v16 = vpop.eup %1379  ;;  %1204 = vmatprep.mubr.msk.f32.mxu0 %vm349_vm0, %v375_v19  ;;  %1232 = vmatprep.mubr.msk.f32.mxu1 %vm1596_vm1, %v1597_v21 }
 0x1db   : > { %v376_v20 = vmul.f32 %v1380_v16, %v1915_v36 }
 0x1dd   : > { %1205 = vmatmul.mubr.msk.f32.vlgmr.msra.gmra.mrb[0].mxu0 %vm349_vm0, %v376_v20 }
 0x1de   : > { %1225 = vmatprep.mubr.msk.f32.mxu0 %vm1596_vm1, %v1597_v21 }
 0x2a8   : > { %v1217_v23 = vpop.f32.mrb[0].mxu1 }
 0x2a9   : > { %v616_v24 = vadd.f32 %v1217_v23, %v1148_v22  ;;  %v610_v25 = vpop.f32.mrb[1].mxu1 }
 0x2aa   : > { %v611_v26 = vadd.f32 %v1148_v22, %v610_v25 }
 0x2ac   : > { %v1359_v28 = vpack.i.bf16 %v616_v24, %v611_v26  ;;  %v1266_v29 = vpack.c.bf16 %v616_v24, %v611_v26  ;;  %v1220_v30 = vpop.f32.mrb[2].mxu1 }
 0x2ad   : > { %v626_v31 = vadd.f32 %v1220_v30, %v1148_v22  ;;  %v620_v32 = vpop.f32.mrb[3].mxu1 }
 0x2ae   : > { %v621_v33 = vadd.f32 %v1148_v22, %v620_v32  ;;  %1360 = vrot.lane.b32.xlu0 %v1359_v28, %s1598_s13  ;;  %1268 = vmatpush3.bf16.xpose.msk.msra.mxu0 %vm1943_vm2, %v1266_v29 }
 0x2af   : > { %1273 = vmatprep.subr.bf16.mxu0 %v1595_v17 }
 0x2b0   : > { %v1364_v35 = vpack.i.bf16 %v626_v31, %v621_v33  ;;  %v1270_v36 = vpack.c.bf16 %v626_v31, %v621_v33  ;;  %v1206_v37 = vpop.f32.mrb[0].mxu0 }
 0x2b1   : > { %v512_v38 = vpop.f32.mrb[1].mxu0  ;;  %v518_v40 = vadd.f32 %v1206_v37, %v1145_v34 }
 0x2b2   : > { %v513_v39 = vadd.f32 %v1145_v34, %v512_v38  ;;  %1365 = vrot.lane.b32.xlu1 %v1364_v35, %s1598_s13  ;;  %1272 = vmatpush3.bf16.xpose.msk.msra.mxu1 %vm1943_vm2, %v1270_v36 }
 0x2b3   : > { %1276 = vmatprep.subr.bf16.mxu1 %v1595_v17 }
 0x2b5   : > { %1226 = vmatmul.mubr.msk.f32.vlgmr.msra.gmra.mrb[2].mxu0 %vm349_vm0, %v513_v39 }
 0x2b6   : > { %1239 = vmatprep.mubr.msk.f32.mxu0 %vm1596_vm1, %v1597_v21 }
 0x2b9   : > { %1233 = vmatmul.mubr.msk.f32.vlgmr.msra.gmra.mrb[4].mxu1 %vm349_vm0, %v518_v40 }
 0x2ba   : > { %1246 = vmatprep.mubr.msk.f32.mxu1 %vm1596_vm1, %v1597_v21 }
 0x320   : > { %v1361_v41 = vpop.permute.xlu0 %1360 }
 0x321   : > { %v1363_v42 = vunpack.i.h.bf16 %v1361_v41  ;;  %v1362_v43 = vunpack.i.l.bf16 %v1361_v41 }
 0x323   : > { %v1274_v44 = vpack.c.bf16 %v1363_v42, %v1362_v43 }
 0x324   : > { %v1366_v45 = vpop.permute.xlu1 %1365 }
 0x325   : > { %v1368_v46 = vunpack.i.h.bf16 %v1366_v45  ;;  %v1367_v47 = vunpack.i.l.bf16 %v1366_v45  ;;  %1275 = vmatpush3.bf16.msra.mxu0 %v1274_v44 }
 0x327   : > { %v1277_v48 = vpack.c.bf16 %v1368_v46, %v1367_v47 }
 0x329   : > { %1278 = vmatpush3.bf16.msra.mxu1 %v1277_v48 }
 0x388   : > { %v704_v49 = vpop.f32.mrb[2].mxu0 }
 0x389   : > { %v788_v50 = vsel %vm787_vm3, %v704_v49, -inf  ;;  %v1227_v51 = vpop.f32.mrb[3].mxu0 }
 0x38a   : > { %v789_v52 = vrot.slane %v788_v50, 4 }
 0x38c   : > { %v790_v53 = vmax.f32 %v788_v50, %v789_v52  ;;  %v783_v54 = vpop.f32.mrb[4].mxu1 }
 0x38d   : > { %v795_v55 = vsel %vm787_vm3, %v783_v54, -inf  ;;  %v1234_v56 = vpop.f32.mrb[5].mxu1 }
 0x38e   : > { %v791_v57 = vrot.slane %v790_v53, 2  ;;  %v796_v58 = vrot.slane %v795_v55, 4 }
 0x390   : > { %v792_v59 = vmax.f32 %v790_v53, %v791_v57  ;;  %v797_v60 = vmax.f32 %v795_v55, %v796_v58 }
 0x392   : > { %v793_v61 = vrot.slane %v792_v59, 1  ;;  %v798_v62 = vrot.slane %v797_v60, 2 }
 0x394   : > { %v794_v63 = vmax.f32 %v792_v59, %v793_v61  ;;  %v799_v0 = vmax.f32 %v797_v60, %v798_v62 }
 0x396   : > { %v802_v1 = vsub.f32 %v704_v49, %v794_v63  ;;  %v800_v2 = vrot.slane %v799_v0, 1 }
 0x398   : > { %v804_v3 = vmul.f32 1.442695, %v802_v1  ;;  %v801_v4 = vmax.f32 %v799_v0, %v800_v2 }
 0x39a   : > { %1381 = vpow2.f32 %v804_v3  ;;  %v803_v5 = vsub.f32 %v783_v54, %v801_v4 }
 0x39c   : > { %v806_v6 = vmul.f32 1.442695, %v803_v5 }
 0x39e   : > { %1383 = vpow2.f32 %v806_v6 }
 0x3a4   : > { %v1382_v7 = vpop.eup %1381 }
 0x3a5   : > { %v808_v8 = vsel %vm787_vm3, %v1382_v7, 0.0 }
 0x3a6   : > { %v809_v9 = vrot.slane %v808_v8, 4 }
 0x3a8   : > { %v1384_v10 = vpop.eup %1383  ;;  %v810_v11 = vadd.f32 %v809_v9, %v808_v8 }
 0x3a9   : > { %v815_v12 = vsel %vm787_vm3, %v1384_v10, 0.0 }
 0x3aa   : > { %v811_v13 = vrot.slane %v810_v11, 2  ;;  %v816_v14 = vrot.slane %v815_v12, 4 }
 0x3ac   : > { %v812_v15 = vadd.f32 %v811_v13, %v810_v11  ;;  %v817_v18 = vadd.f32 %v816_v14, %v815_v12 }
 0x3ae   : > { %v813_v19 = vrot.slane %v812_v15, 1  ;;  %v818_v16 = vrot.slane %v817_v18, 2 }
 0x3b0   : > { %v814_v20 = vadd.f32 %v813_v19, %v812_v15  ;;  %v819_v17 = vadd.f32 %v818_v16, %v817_v18 }
 0x3b2   : > { %1385 = vrcp.f32 %v814_v20  ;;  %v820_v21 = vrot.slane %v819_v17, 1 }
 0x3b4   : > { %v821_v22 = vadd.f32 %v820_v21, %v819_v17 }
 0x3b6   : > { %1387 = vrcp.f32 %v821_v22 }
 0x3bc   : > { %v1386_v23 = vpop.eup %1385 }
 0x3bd   : > { %v824_v24 = vmul.f32 %v1386_v23, %v1382_v7 }
 0x3bf   : > { %v826_v25 = vadd.f32 1e-08, %v824_v24 }
 0x3c0   : > { %v1388_v26 = vpop.eup %1387 }
 0x3c1   : > { %1240 = vmatmul.mubr.msk.f32.vlgmr.msra.gmra.mrb[4].mxu0 %vm787_vm3, %v826_v25  ;;  %v828_v27 = vsel %vm787_vm3, %v826_v25, 0.0  ;;  %v825_v28 = vmul.f32 %v1388_v26, %v1384_v10 }
 0x3c2   : > { %829 = vadd.xlane.f32.xlu1 %v828_v27 }
 0x3c3   : > { %v827_v29 = vadd.f32 1e-08, %v825_v28 }
 0x3c5   : > { %1247 = vmatmul.mubr.msk.f32.vlgmr.msra.gmra.mrb[6].mxu1 %vm787_vm3, %v827_v29  ;;  %v831_v30 = vsel %vm787_vm3, %v827_v29, 0.0 }
 0x3c6   : > { %832 = vadd.xlane.f32.xlu0 %v831_v30 }
 0x44f   : > { %v830_v31 = vpop.xlane.xlu1 %829 }
 0x450   : > { %1389 = vrcp.f32 %v830_v31 }
 0x453   : > { %v833_v32 = vpop.xlane.xlu0 %832 }
 0x454   : > { %1391 = vrcp.f32 %v833_v32 }
 0x45a   : > { %v1390_v33 = vpop.eup %1389 }
 0x45e   : > { %v1392_v37 = vpop.eup %1391 }
 0x494   : > { %v909_v34 = vpop.f32.mrb[4].mxu0 }
 0x495   : > { %v994_v35 = vmul.f32 %v1390_v33, %v909_v34  ;;  %v1241_v36 = vpop.f32.mrb[5].mxu0 }
 0x497   : > { %996 = vst.msk [vmem:[%s339_s17] sm:$0xff] %vm349_vm0, %v994_v35 }
 0x498   : > { %v988_v38 = vpop.f32.mrb[6].mxu1 }
 0x499   : > { %v995_v39 = vmul.f32 %v1392_v37, %v988_v38  ;;  %v1248_v40 = vpop.f32.mrb[7].mxu1 }
 0x49b   : > { %997 = vst.msk [vmem:[%s339_s17 + $0x8] sm:$0xff] %vm349_vm0, %v995_v39 }
 0x49c   : > { %1522 = shalt.err (!%p1519_p7)
}
 0x49d   : > { %s1523_s4 = scalar_lea.hbm %s1975_s26, 256  ;;  %s1527_s27 = scalar_lea.hbm %s2026_s6, 512 }
 0x49e   : > { %p1524_p9 = scmp.ne.s32.totalorder %s1975_s26, %s1523_s4  ;;  %p1528_p11 = scmp.lt.u32.totalorder %s1975_s26, %s2026_s6 }
 0x49f   : > { %p1529_p2 = scmp.lt.u32.totalorder %s1527_s27, %s1523_s4  ;;  %p1531_p1 = scmp.lt.u32.totalorder %s1523_s4, %s1975_s26 }
 0x4a0   : > { %p1525_p0 = pnand %p1524_p9, %p2058_p13 }
 0x4a1   : > { %p1530_p12 = por %p1529_p2, %p1528_p11 }
 0x4a2   : > { %p1526_p8 = pneg %p1525_p0 }
 0x4a3   : > { %p1532_p6 = por %p1531_p1, %p1530_p12 }
 0x4a5   : > { %p1533_p10 = pnand %p1532_p6, %p1526_p8 }
 0x4a7   : > { %1536 = shalt.err (!%p1533_p10)
}
 0x4a8   : > { %s1600_s16 = smov 128   ;;  %s1601_s12 = smov 8  }
 0x4a9   : > { %1291 = dma.vmem_to_hbm [thread:$0]  (%p2058_p13), %s1970_s7, 256, %s1975_s26, %s999_s20, %s1600_s16, %s1600_s16, %s1601_s12  }
 0x4aa PF: > { %s1027_s17 = sand.u32 1, %s1575_s21   ;;  %p2059_p4 = scmp.ne.s32.totalorder %s2038_s28, 0 }
 0x4ab   : > { %p2060_p5 = scmp.ge.s32.totalorder %s1587_s24, 2  ;;  %s1028_s2 = scalar_lea.sflag [#allocation4], %s1027_s17 }
 0x4ad   : > { %p1308_p3 = pnand %p2060_p5, %p2059_p4 }
 0x4af   : > { %1570 = dma.done.wait (!%p1308_p3), %s1028_s2, 256  }
 0x4b0   : > { %1572 = vsyncadd (!%p1308_p3), %s1028_s2, 4294967040  ;;  %s2061_s30 = sld [smem:[#allocation16_spill]]  ;;  %p23_p7 = scmp.ge.s32.totalorder %s1753_s8, 4  }
 0x4b1   : > { %s2062_s21 = smov %s1579_s22  ;;  %s2063_s22 = smov %s1583_s23 }
 0x4b2   : > { %s2065_s24 = smov %s1753_s8  ;;  %25 = sbr.rel (!%p23_p7) target bundleno = 12 (0xc), region = 110 }
 0x4b6   : > { %s2064_s23 = smov %s2061_s30 }
 0x4b9   :  { %1033 = vsyncpa [#allocation3], 1 }
 0x4ba   :  { %1035 = vsyncpa [#allocation3 + $0x1], 1 }
 0x4bb   :  { %1036 = vsyncpa [#allocation6], 1 }
 0x4bc   :  { %1038 = vsyncpa [#allocation6 + $0x1], 1 }
 0x4bd   :  { %1039 = vsyncpa [#allocation9], 1 }
 0x4be   :  { %1040 = vsyncpa [#allocation4], 1 }
 0x4bf   :  { %1042 = vsyncpa [#allocation4 + $0x1], 1 }

</bundles_post_ra>
